<compile_context>
chip_gen: v5e
topology: v5e:2x2
jax: 0.10.0
libtpu: 0.0.40
codegen_flags: <defaults>
</compile_context>

<pallas_src>
import functools

import jax
import jax.numpy as jnp
from jax.experimental import pallas as pl
from jax.experimental.pallas import tpu as pltpu


def _round_up(n, m):
    return ((n + m - 1) // m) * m


def sublayer_connection_kernel(x_ref, a2_ref, b2_ref, w_ref, bias_ref, *rest,
                               eps, dropout_p, keep_scale, drop_threshold, tn):
    if dropout_p > 0.0:
        bits_ref, o_ref = rest
    else:
        (o_ref,) = rest

    j = pl.program_id(1)
    x = x_ref[...]                                   # (TM, H) f32, full row
    H = x.shape[-1]

    # ---- LayerNorm (torch.std is unbiased -> divisor H-1, eps added to std) ----
    mean = jnp.mean(x, axis=-1, keepdims=True)
    xc = x - mean
    var = jnp.sum(xc * xc, axis=-1, keepdims=True) / (H - 1)
    inv = 1.0 / (jnp.sqrt(var) + eps)                # (TM, 1): one divide per row
    normed = (xc * inv) * a2_ref[...] + b2_ref[...]

    # ---- sublayer: Linear(H, H) column tile on the MXU (bf16 in, f32 acc) ----
    outs = jnp.dot(normed.astype(jnp.bfloat16), w_ref[...],
                   preferred_element_type=jnp.float32) + bias_ref[...]

    # ---- dropout: integer threshold on precomputed uniform uint32 bits ----
    if dropout_p > 0.0:
        keep = bits_ref[...] >= jnp.uint32(drop_threshold)
        outs = jnp.where(keep, outs * keep_scale, 0.0)

    # ---- residual: the x columns matching this output tile ----
    if tn == H:
        x_cols = x
    else:
        x_cols = jax.lax.dynamic_slice_in_dim(x, j * tn, tn, axis=1)
    o_ref[...] = (x_cols + outs).astype(o_ref.dtype)


def sublayer_connection(x, a2, b2, w, bias, *, eps=1e-6, dropout_p=0.1,
                        rng_key=None, train=True, tile_rows=256, tile_cols=256):
    """x: (rows, hidden) f32; a2/b2/bias: (hidden,); w: (hidden, hidden)."""
    R, H = x.shape
    p = float(dropout_p) if train else 0.0

    # Row tiling: big tiles (pad rows with zeros if needed).
    tm = min(tile_rows, _round_up(R, 8))
    Rp = _round_up(R, tm)
    xp = x if Rp == R else jnp.pad(x, ((0, Rp - R), (0, 0)))

    # Column (output-N) tiling: bounds resident weight to (H, tn) per step.
    tn = tile_cols if (H % tile_cols == 0) else H

    inputs = [
        xp,
        a2.reshape(1, H).astype(jnp.float32),
        b2.reshape(1, H).astype(jnp.float32),
        w.astype(jnp.bfloat16),                      # bf16 weights: MXU-native, half HBM
        bias.reshape(1, H).astype(jnp.float32),
    ]
    in_specs = [
        pl.BlockSpec((tm, H), lambda i, j: (i, 0)),   # x full row tile
        pl.BlockSpec((1, H), lambda i, j: (0, 0)),    # a_2 (gamma)
        pl.BlockSpec((1, H), lambda i, j: (0, 0)),    # b_2 (beta)
        pl.BlockSpec((H, tn), lambda i, j: (0, j)),   # weight column tile
        pl.BlockSpec((1, tn), lambda i, j: (0, j)),   # bias column tile
    ]

    drop_threshold = 0
    if p > 0.0:
        if rng_key is None:
            rng_key = jax.random.PRNGKey(0)
        # TODO(synk): dropout bits come from jax.random (host/XLA PRNG), so the
        # mask is deterministic per key but does not bit-match torch.nn.Dropout.
        bits = jax.random.bits(rng_key, (Rp, H), dtype=jnp.uint32)
        inputs.append(bits)
        in_specs.append(pl.BlockSpec((tm, tn), lambda i, j: (i, j)))
        drop_threshold = min(int(round(p * (2 ** 32))), 2 ** 32 - 1)

    kernel = functools.partial(
        sublayer_connection_kernel,
        eps=float(eps),
        dropout_p=p,
        keep_scale=(1.0 / (1.0 - p)) if p > 0.0 else 1.0,
        drop_threshold=drop_threshold,
        tn=tn,
    )

    flops = 2 * Rp * H * H
    bytes_accessed = (xp.size * 4 + w.size * 2 + H * 4 * 3 + Rp * H * 4
                      + (Rp * H * 4 if p > 0.0 else 0))

    out = pl.pallas_call(
        kernel,
        out_shape=jax.ShapeDtypeStruct((Rp, H), x.dtype),
        grid=(Rp // tm, H // tn),
        in_specs=in_specs,
        out_specs=pl.BlockSpec((tm, tn), lambda i, j: (i, j)),
        compiler_params=pltpu.CompilerParams(
            dimension_semantics=("parallel", "parallel"),
            vmem_limit_bytes=64 * 1024 * 1024),
        cost_estimate=pl.CostEstimate(
            flops=flops, transcendentals=Rp, bytes_accessed=bytes_accessed),
    )(*inputs)

    return out[:R] if Rp != R else out


def _reference_no_dropout(x, a2, b2, w, bias, eps=1e-6):
    # Mirrors the kernel math (unbiased std, eps on std, bf16 matmul, f32 acc).
    mean = jnp.mean(x, axis=-1, keepdims=True)
    xc = x - mean
    var = jnp.sum(xc * xc, axis=-1, keepdims=True) / (x.shape[-1] - 1)
    inv = 1.0 / (jnp.sqrt(var) + eps)
    normed = (xc * inv) * a2 + b2
    lin = jnp.dot(normed.astype(jnp.bfloat16), w.astype(jnp.bfloat16),
                  preferred_element_type=jnp.float32) + bias
    return x + lin


if __name__ == "__main__":
    # Small but lane-dense shapes: hidden is a multiple of 128.
    batch, seq, hidden = 2, 8, 128
    key = jax.random.PRNGKey(0)
    kx, kw, kd = jax.random.split(key, 3)

    x = jax.random.normal(kx, (batch, seq, hidden), dtype=jnp.float32)
    x2d = x.reshape(batch * seq, hidden)

    # LayerNorm defaults + a small linear sublayer.
    a2 = jnp.ones((hidden,), jnp.float32)        # LayerNorm.a_2
    b2 = jnp.zeros((hidden,), jnp.float32)       # LayerNorm.b_2
    w = jax.random.normal(kw, (hidden, hidden), dtype=jnp.float32) / jnp.sqrt(hidden)
    bias = jnp.zeros((hidden,), jnp.float32)

    # Correctness check with dropout disabled (eval-mode semantics).
    out_eval = sublayer_connection(x2d, a2, b2, w, bias,
                                   dropout_p=0.0, train=False)
    ref = _reference_no_dropout(x2d, a2, b2, w, bias)
    assert jnp.allclose(out_eval, ref, atol=5e-3, rtol=5e-3), \
        float(jnp.max(jnp.abs(out_eval - ref)))

    # Training-mode run with dropout p=0.1 (integer-threshold mask in kernel).
    out_train = sublayer_connection(x2d, a2, b2, w, bias,
                                    dropout_p=0.1, rng_key=kd, train=True)
    jax.block_until_ready(out_train)

    out = out_train.reshape(batch, seq, hidden)
    assert out.shape == (batch, seq, hidden)
    assert bool(jnp.all(jnp.isfinite(out)))
    print("KERNEL_OK")
</pallas_src>

<mosaic_0001>
module attributes {stable_mosaic.version = 11 : i64} {
  func.func @sublayer_connection_kernel(%arg0: i32, %arg1: i32, %arg2: memref<16x128xf32, #tpu.memory_space<vmem>>, %arg3: memref<1x128xf32, #tpu.memory_space<vmem>>, %arg4: memref<1x128xf32, #tpu.memory_space<vmem>>, %arg5: memref<128x128xbf16, #tpu.memory_space<vmem>>, %arg6: memref<1x128xf32, #tpu.memory_space<vmem>>, %arg7: memref<16x128xf32, #tpu.memory_space<vmem>>) attributes {dimension_semantics = [#tpu.dimension_semantics<parallel>, #tpu.dimension_semantics<parallel>], iteration_bounds = array<i64: 1, 1>, scalar_prefetch = 0 : i64, scratch_operands = 0 : i64, tpu.core_type = #tpu.core_type<tc>, window_params = [{transform_indices = @transform_0, window_bounds = array<i64: 16, 128>}, {pipeline_mode = #tpu.pipeline_mode<synchronous>, transform_indices = @transform_1, window_bounds = array<i64: 1, 128>}, {pipeline_mode = #tpu.pipeline_mode<synchronous>, transform_indices = @transform_2, window_bounds = array<i64: 1, 128>}, {transform_indices = @transform_3, window_bounds = array<i64: 128, 128>}, {transform_indices = @transform_4, window_bounds = array<i64: 1, 128>}, {transform_indices = @transform_5, window_bounds = array<i64: 16, 128>}]} {
    %c0 = arith.constant 0 : index
    %c0_0 = arith.constant 0 : index
    %0 = vector.load %arg2[%c0, %c0_0] : memref<16x128xf32, #tpu.memory_space<vmem>>, vector<16x128xf32>
    %cst = arith.constant dense<0.000000e+00> : vector<16xf32>
    %1 = vector.multi_reduction <add>, %0, %cst [1] : vector<16x128xf32> to vector<16xf32>
    %2 = vector.shape_cast %1 : vector<16xf32> to vector<16x1xf32>
    %cst_1 = arith.constant 1.280000e+02 : f32
    %3 = vector.broadcast %cst_1 : f32 to vector<16x1xf32>
    %4 = arith.divf %2, %3 : vector<16x1xf32>
    %5 = vector.broadcast %4 : vector<16x1xf32> to vector<16x128xf32>
    %6 = arith.subf %0, %5 : vector<16x128xf32>
    %7 = arith.mulf %6, %6 : vector<16x128xf32>
    %cst_2 = arith.constant dense<0.000000e+00> : vector<16xf32>
    %8 = vector.multi_reduction <add>, %7, %cst_2 [1] : vector<16x128xf32> to vector<16xf32>
    %9 = vector.shape_cast %8 : vector<16xf32> to vector<16x1xf32>
    %cst_3 = arith.constant 1.270000e+02 : f32
    %10 = vector.broadcast %cst_3 : f32 to vector<16x1xf32>
    %11 = arith.divf %9, %10 : vector<16x1xf32>
    %12 = math.sqrt %11 : vector<16x1xf32>
    %cst_4 = arith.constant 9.99999997E-7 : f32
    %13 = vector.broadcast %cst_4 : f32 to vector<16x1xf32>
    %14 = arith.addf %12, %13 : vector<16x1xf32>
    %cst_5 = arith.constant 1.000000e+00 : f32
    %15 = vector.broadcast %cst_5 : f32 to vector<16x1xf32>
    %16 = arith.divf %15, %14 : vector<16x1xf32>
    %17 = vector.broadcast %16 : vector<16x1xf32> to vector<16x128xf32>
    %18 = arith.mulf %6, %17 : vector<16x128xf32>
    %c0_6 = arith.constant 0 : index
    %c0_7 = arith.constant 0 : index
    %19 = vector.load %arg3[%c0_6, %c0_7] : memref<1x128xf32, #tpu.memory_space<vmem>>, vector<1x128xf32>
    %20 = vector.broadcast %19 : vector<1x128xf32> to vector<16x128xf32>
    %21 = arith.mulf %18, %20 : vector<16x128xf32>
    %c0_8 = arith.constant 0 : index
    %c0_9 = arith.constant 0 : index
    %22 = vector.load %arg4[%c0_8, %c0_9] : memref<1x128xf32, #tpu.memory_space<vmem>>, vector<1x128xf32>
    %23 = vector.broadcast %22 : vector<1x128xf32> to vector<16x128xf32>
    %24 = arith.addf %21, %23 : vector<16x128xf32>
    %25 = arith.truncf %24 : vector<16x128xf32> to vector<16x128xbf16>
    %c0_10 = arith.constant 0 : index
    %c0_11 = arith.constant 0 : index
    %26 = vector.load %arg5[%c0_10, %c0_11] : memref<128x128xbf16, #tpu.memory_space<vmem>>, vector<128x128xbf16>
    %cst_12 = arith.constant dense<0.000000e+00> : vector<16x128xf32>
    %27 = tpu.matmul %25, %26, %cst_12 {dimension_numbers = #tpu.dot_dimension_numbers<[1], [0], [0], [1], [0, 0, 1, 1], [], []>} : vector<16x128xbf16>, vector<128x128xbf16>, vector<16x128xf32> -> vector<16x128xf32>
    %c0_13 = arith.constant 0 : index
    %c0_14 = arith.constant 0 : index
    %28 = vector.load %arg6[%c0_13, %c0_14] : memref<1x128xf32, #tpu.memory_space<vmem>>, vector<1x128xf32>
    %29 = vector.broadcast %28 : vector<1x128xf32> to vector<16x128xf32>
    %30 = arith.addf %27, %29 : vector<16x128xf32>
    %31 = arith.addf %0, %30 : vector<16x128xf32>
    %c0_15 = arith.constant 0 : index
    %c0_16 = arith.constant 0 : index
    %32 = vector.load %arg7[%c0_15, %c0_16] : memref<16x128xf32, #tpu.memory_space<vmem>>, vector<16x128xf32>
    tpu.vector_store %arg7[%c0_15, %c0_16], %31 {strides = array<i32>} : memref<16x128xf32, #tpu.memory_space<vmem>>, vector<16x128xf32>,
    return
  }
  func.func @transform_0(%arg0: i32, %arg1: i32) -> (i32, i32) {
    %c0_i32 = arith.constant 0 : i32
    %c0_i32_0 = arith.constant 0 : i32
    return %arg0, %c0_i32 : i32, i32
  }
  func.func @transform_1(%arg0: i32, %arg1: i32) -> (i32, i32) {
    %c0_i32 = arith.constant 0 : i32
    %c0_i32_0 = arith.constant 0 : i32
    %c0_i32_1 = arith.constant 0 : i32
    return %c0_i32, %c0_i32_0 : i32, i32
  }
  func.func @transform_2(%arg0: i32, %arg1: i32) -> (i32, i32) {
    %c0_i32 = arith.constant 0 : i32
    %c0_i32_0 = arith.constant 0 : i32
    %c0_i32_1 = arith.constant 0 : i32
    return %c0_i32, %c0_i32_0 : i32, i32
  }
  func.func @transform_3(%arg0: i32, %arg1: i32) -> (i32, i32) {
    %c0_i32 = arith.constant 0 : i32
    %c0_i32_0 = arith.constant 0 : i32
    return %c0_i32, %arg1 : i32, i32
  }
  func.func @transform_4(%arg0: i32, %arg1: i32) -> (i32, i32) {
    %c0_i32 = arith.constant 0 : i32
    %c0_i32_0 = arith.constant 0 : i32
    return %c0_i32, %arg1 : i32, i32
  }
  func.func @transform_5(%arg0: i32, %arg1: i32) -> (i32, i32) {
    %c0_i32 = arith.constant 0 : i32
    return %arg0, %arg1 : i32, i32
  }
}

</mosaic_0001>

<bundles_post_ra>
// kernel: tpu_custom_call.1
= control target key start
LH: loop header
LB: loop body
LE: loop exit
PB: predicated region body
PF: predicated region fallthrough
CT: control target
= control target key end

     0   :  { %10 = vsyncpa [#allocation3], 0  ;;  %s526_s0 = inlined_call_operand.hbm [shape: f32[16,128], index: 0, kind: input, shape index: {}]   ;;  %s527_s1 = inlined_call_operand.hbm [shape: f32[1,128], index: 1, kind: input, shape index: {}]   ;;  %s528_s2 = inlined_call_operand.vmem [shape: f32[1,128], index: 2, kind: input, shape index: {}]   ;;  %s529_s3 = inlined_call_operand.hbm [shape: bf16[128,128], index: 3, kind: input, shape index: {}]   ;;  %s530_s4 = inlined_call_operand.vmem [shape: f32[1,128], index: 4, kind: input, shape index: {}]   ;;  %s531_s5 = inlined_call_operand.hbm [shape: f32[16,128], index: 5, kind: output, shape index: {}]  }
   0x1   :  { %11 = vsyncpa [#allocation6], 0  ;;  %s31_s20 = sshll.u32 %s527_s1, 4  ;;  %s32_s20 = int_to_ptr.hbm [resolvable:$true] %s31_s20 }
   0x2   :  { %12 = vsyncpa [#allocation4], 0  ;;  %s442_s21 = smov [#allocation5]   ;;  %s17_s25 = sshll.u32 %s526_s0, 4  ;;  %s18_s25 = int_to_ptr.hbm [resolvable:$true] %s17_s25 }
   0x3   :  { %s33_s22 = sshll.u32 %s442_s21, 4  ;;  %s443_s26 = smov [#allocation2]   ;;  %s34_s22 = int_to_ptr.vmem [resolvable:$true] %s33_s22 }
   0x4   :  { %36 = dma.hbm_to_vmem [thread:$0]  %s32_s20, 16, %s34_s22, [#allocation6]  }
   0x5   :  { %s19_s27 = sshll.u32 %s443_s26, 4  ;;  %s444_s28 = smov 128   ;;  %s20_s27 = int_to_ptr.vmem [resolvable:$true] %s19_s27 }
   0x6   :  { %s445_s29 = smov 8   ;;  %s43_s6 = sshll.u32 %s529_s3, 4  ;;  %s44_s6 = int_to_ptr.hbm [resolvable:$true] %s43_s6 }
   0x7   :  { %25 = dma.hbm_to_vmem [thread:$0]  %s18_s25, 256, %s20_s27, [#allocation3], %s444_s28, %s444_s28, %s445_s29  }
   0x8   :  { %s446_s7 = smov [#allocation7]   ;;  %s447_s0 = smov 64  }
   0x9   :  { %s45_s8 = sshll.u32 %s446_s7, 4  ;;  %s448_s9 = smov 4   ;;  %s46_s8 = int_to_ptr.vmem [resolvable:$true] %s45_s8 }
   0xa   :  { %51 = dma.hbm_to_vmem [thread:$0]  %s44_s6, 1024, %s46_s8, [#allocation6], %s447_s0, %s447_s0, %s448_s9  }
   0xb   :  { %436 = dma.done.wait [#allocation3], 256  }
   0xc   :  { %437 = vsyncadd [#allocation3], 4294967040 }
   0xd   :  { %438 = dma.done.wait [#allocation6], 1040  }
   0xe   :  { %439 = vsyncadd [#allocation6], 4294966256  ;;  %v494_v0 = vld [vmem:[#allocation2] sm:$0xff]  ;;  %v497_v1 = vld [vmem:[#allocation2 + $0x8] sm:$0xff]  ;;  %v449_v2 = vmov 128.0   ;;  %v450_v17 = vmov 127.0  }
   0xf   :  { %68 = vadd.xlane.f32.xlu0 %v494_v0  ;;  %328 = vrcp.f32 %v449_v2  ;;  %v314_v23 = vld [vmem:[#allocation7 + $0x38] sm:$0xff]  ;;  %v313_v25 = vld [vmem:[#allocation7 + $0x30] sm:$0xff]  ;;  %v312_v27 = vld [vmem:[#allocation7 + $0x28] sm:$0xff]  ;;  %s451_s13 = smov [#allocation8]  }
  0x10   :  { %330 = vrcp.f32 %v450_v17  ;;  %237 = vmatpush.bf16.msra.mxu0 %v314_v23  ;;  %v311_v29 = vld [vmem:[#allocation7 + $0x20] sm:$0xff]  ;;  %v310_v31 = vld [vmem:[#allocation7 + $0x18] sm:$0xff]  ;;  %v309_v36 = vld [vmem:[#allocation7 + $0x10] sm:$0xff]  ;;  %s259_s14 = sshll.u32 %s451_s13, 4  ;;  %s260_s14 = int_to_ptr.vmem [resolvable:$true] %s259_s14 }
  0x11   :  { %v308_v39 = vld [vmem:[#allocation7 + $0x8] sm:$0xff]  ;;  %v307_v45 = vld [vmem:[#allocation7] sm:$0xff] }
  0x14   :  { %238 = vmatpush.bf16.msra.mxu0 %v313_v25 }
  0x15   :  { %v329_v3 = vpop.eup %328 }
  0x16   :  { %v73_v4 = vmul.f32 128.0, %v329_v3  ;;  %vm77_vm0 = vweird.f32 %v329_v3  ;;  %v331_v18 = vpop.eup %330 }
  0x17   :  { %70 = vadd.xlane.f32.xlu0 %v497_v1  ;;  %v90_v19 = vmul.f32 127.0, %v331_v18  ;;  %vm94_vm1 = vweird.f32 %v331_v18 }
  0x18   :  { %v74_v5 = vsub.f32 1.0, %v73_v4  ;;  %239 = vmatpush.bf16.msra.mxu0 %v312_v27 }
  0x19   :  { %v91_v20 = vsub.f32 1.0, %v90_v19 }
  0x1a   :  { %v75_v6 = vmul.f32 %v329_v3, %v74_v5 }
  0x1b   :  { %v92_v21 = vmul.f32 %v331_v18, %v91_v20 }
  0x1c   :  { %v76_v7 = vadd.f32 %v329_v3, %v75_v6  ;;  %240 = vmatpush.bf16.msra.mxu0 %v311_v29 }
  0x1d   :  { %v93_v22 = vadd.f32 %v331_v18, %v92_v21 }
  0x1e   :  { %v78_v8 = vsel %vm77_vm0, %v329_v3, %v76_v7 }
  0x1f   :  { %v95_v24 = vsel %vm94_vm1, %v331_v18, %v93_v22  ;;  %v326_v22 = vld [vmem:[%s528_s2] ss:$0 sm:$0xff]  ;;  %s261_s2 = sshll.u32 %s531_s5, 4  ;;  %s262_s2 = int_to_ptr.hbm [resolvable:$true] %s261_s2 }
  0x20   :  { %241 = vmatpush.bf16.msra.mxu0 %v310_v31 }
  0x24   :  { %242 = vmatpush.bf16.msra.mxu0 %v309_v36 }
  0x28   :  { %243 = vmatpush.bf16.msra.mxu0 %v308_v39 }
  0x2c   :  { %244 = vmatpush.bf16.msra.mxu0 %v307_v45 }
  0x82   :  { %v69_v9 = vpop.xlane.xlu0 %68 }
  0x83   :  { %v79_v10 = vmul.f32 %v78_v8, %v69_v9 }
  0x85   :  { %v501_v11 = vsub.f32 %v494_v0, %v79_v10 }
  0x87   :  { %v83_v12 = vmul.f32 %v501_v11, %v501_v11 }
  0x89   :  { %85 = vadd.xlane.f32.xlu1 %v83_v12 }
  0x8a   :  { %v71_v13 = vpop.xlane.xlu0 %70 }
  0x8b   :  { %v80_v14 = vmul.f32 %v78_v8, %v71_v13 }
  0x8d   :  { %v506_v15 = vsub.f32 %v497_v1, %v80_v14 }
  0x8f   :  { %v84_v16 = vmul.f32 %v506_v15, %v506_v15 }
  0x91   :  { %87 = vadd.xlane.f32.xlu1 %v84_v16  ;;  %v325_v16 = vld [vmem:[#allocation5] ss:$0 sm:$0xff] }
  0xfc   :  { %v86_v26 = vpop.xlane.xlu1 %85 }
  0xfd   :  { %v96_v28 = vmul.f32 %v95_v24, %v86_v26 }
  0xff   :  { %332 = vrsqrt.f32 %v96_v28  ;;  %vm105_vm2 = vcmp.eq.f32.partialorder %v96_v28, inf  ;;  %v108_v46 = vand.u32 2147483648, %v96_v28  ;;  %vm107_vm3 = vcmp.eq.f32.partialorder %v96_v28, 0.0 }
 0x104   :  { %v88_v30 = vpop.xlane.xlu1 %87 }
 0x105   :  { %v333_v32 = vpop.eup %332  ;;  %v97_v33 = vmul.f32 %v95_v24, %v88_v30 }
 0x106   :  { %v99_v34 = vmul.f32 %v333_v32, %v96_v28 }
 0x107   :  { %334 = vrsqrt.f32 %v97_v33  ;;  %vm117_vm4 = vcmp.eq.f32.partialorder %v97_v33, inf  ;;  %v120_v54 = vand.u32 2147483648, %v97_v33  ;;  %vm119_vm5 = vcmp.eq.f32.partialorder %v97_v33, 0.0 }
 0x108   :  { %v100_v35 = vmul.f32 %v333_v32, %v99_v34 }
 0x10a   :  { %v101_v37 = vmul.f32 0.5, %v100_v35 }
 0x10c   :  { %v102_v38 = vsub.f32 1.5, %v101_v37 }
 0x10d   :  { %v335_v40 = vpop.eup %334 }
 0x10e   :  { %v103_v41 = vmul.f32 %v333_v32, %v102_v38  ;;  %v111_v42 = vmul.f32 %v335_v40, %v97_v33 }
 0x110   :  { %v104_v43 = vmul.f32 %v103_v41, %v96_v28  ;;  %v112_v44 = vmul.f32 %v335_v40, %v111_v42 }
 0x112   :  { %v106_v47 = vsel %vm105_vm2, %v96_v28, %v104_v43  ;;  %v113_v48 = vmul.f32 0.5, %v112_v44 }
 0x113   :  { %v109_v49 = vsel %vm107_vm3, %v108_v46, %v106_v47 }
 0x114   :  { %v114_v50 = vsub.f32 1.5, %v113_v48  ;;  %v122_v51 = vadd.f32 1e-06, %v109_v49 }
 0x116   :  { %v115_v52 = vmul.f32 %v335_v40, %v114_v50  ;;  %336 = vrcp.f32 %v122_v51  ;;  %v135_v62 = vand.u32 2147483648, %v122_v51  ;;  %vm129_vm7 = vweird.f32 %v122_v51 }
 0x117   :  { %v133_v2 = vand.u32 2147483647, %v122_v51 }
 0x118   :  { %v116_v53 = vmul.f32 %v115_v52, %v97_v33  ;;  %v136_v6 = vor.u32 1.1754944e-38, %v135_v62 }
 0x119   :  { %vm134_vm9 = vcmp.eq.f32.partialorder %v133_v2, 8.507059e+37 }
 0x11a   :  { %v118_v55 = vsel %vm117_vm4, %v97_v33, %v116_v53 }
 0x11b   :  { %v121_v56 = vsel %vm119_vm5, %v120_v54, %v118_v55 }
 0x11c   :  { %v337_v57 = vpop.eup %336  ;;  %v123_v58 = vadd.f32 1e-06, %v121_v56 }
 0x11d   :  { %v125_v59 = vmul.f32 %v337_v57, %v122_v51  ;;  %vm130_vm6 = vweird.f32 %v337_v57 }
 0x11e   :  { %338 = vrcp.f32 %v123_v58  ;;  %vm131_vm8 = vmor %vm129_vm7, %vm130_vm6  ;;  %v150_v9 = vand.u32 2147483648, %v123_v58  ;;  %v148_v12 = vand.u32 2147483647, %v123_v58  ;;  %vm144_vm11 = vweird.f32 %v123_v58 }
 0x11f   :  { %v126_v60 = vsub.f32 1.0, %v125_v59 }
 0x120   :  { %v151_v17 = vor.u32 1.1754944e-38, %v150_v9  ;;  %vm149_vm13 = vcmp.eq.f32.partialorder %v148_v12, 8.507059e+37 }
 0x121   :  { %v127_v61 = vmul.f32 %v337_v57, %v126_v60 }
 0x123   :  { %v128_v63 = vadd.f32 %v337_v57, %v127_v61 }
 0x124   :  { %v339_v3 = vpop.eup %338 }
 0x125   :  { %v132_v4 = vsel %vm131_vm8, %v337_v57, %v128_v63  ;;  %v140_v5 = vmul.f32 %v339_v3, %v123_v58  ;;  %vm145_vm10 = vweird.f32 %v339_v3 }
 0x126   :  { %v137_v8 = vsel %vm134_vm9, %v136_v6, %v132_v4  ;;  %vm146_vm12 = vmor %vm144_vm11, %vm145_vm10 }
 0x127   :  { %v141_v7 = vsub.f32 1.0, %v140_v5  ;;  %v154_v14 = vmul.f32 %v137_v8, %v501_v11  ;;  %v327_v11 = vld [vmem:[%s530_s4] ss:$0 sm:$0xff] }
 0x129   :  { %v142_v10 = vmul.f32 %v339_v3, %v141_v7  ;;  %v160_v21 = vmul.f32 %v325_v16, %v154_v14 }
 0x12b   :  { %v143_v13 = vadd.f32 %v339_v3, %v142_v10  ;;  %v166_v24 = vadd.f32 %v326_v22, %v160_v21 }
 0x12d   :  { %v147_v18 = vsel %vm146_vm12, %v339_v3, %v143_v13 }
 0x12e   :  { %v152_v19 = vsel %vm149_vm13, %v151_v17, %v147_v18 }
 0x12f   :  { %v155_v20 = vmul.f32 %v152_v19, %v506_v15 }
 0x131   :  { %v161_v23 = vmul.f32 %v325_v16, %v155_v20 }
 0x133   :  { %v167_v25 = vadd.f32 %v326_v22, %v161_v23 }
 0x135   :  { %v168_v26 = vpack.c.bf16 %v167_v25, %v166_v24 }
 0x137   :  { %245 = vmatmul.bf16.vlgmr.msra.gmra.mxu0 %v168_v26 }
 0x1b4   :  { %v246_v27 = vpop.f32.mrf.mxu0 }
 0x1b5   :  { %v247_v28 = vadd.f32 %v327_v11, %v246_v27 }
 0x1b7   :  { %v251_v29 = vadd.f32 %v247_v28, %v494_v0 }
 0x1b9   :  { %253 = vst [vmem:[#allocation8] sm:$0xff] %v251_v29 }
 0x1bc   :  { %v248_v15 = vpop.f32.mrf.mxu0 }
 0x1bd   :  { %v249_v30 = vadd.f32 %v327_v11, %v248_v15 }
 0x1bf   :  { %v252_v31 = vadd.f32 %v249_v30, %v497_v1 }
 0x1c1   :  { %254 = vst [vmem:[#allocation8 + $0x8] sm:$0xff] %v252_v31 }
 0x1c2   :  { %267 = dma.vmem_to_hbm [thread:$0]  %s260_s14, 256, %s262_s2, [#allocation4], %s444_s28, %s444_s28, %s445_s29  }
 0x1c3   :  { %440 = dma.done.wait [#allocation4], 256  }
 0x1c4   :  { %441 = vsyncadd [#allocation4], 4294967040 }
 0x1c5   :  { %272 = vsyncpa [#allocation3], 1 }
 0x1c6   :  { %273 = vsyncpa [#allocation6], 1 }
 0x1c7   :  { %274 = vsyncpa [#allocation4], 1 }

</bundles_post_ra>
